<compile_context>
chip_gen: v7x
topology: tpu7x:2x2x1
jax: 0.10.0
libtpu: 0.0.40
codegen_flags: <defaults>
</compile_context>

<pallas_src>
import jax
import jax.numpy as jnp
from jax.experimental import pallas as pl
from jax.experimental.pallas import tpu as pltpu

LANE = 128
SUBLANE = 8


def _round_up(x, m):
    return (x + m - 1) // m * m


# ----------------------------------------------------------------------------
# Kernel: one batch tile -> single matmul + bias + sigmoid.
# x is f32 in VMEM (cast to bf16 in-register), W is bf16, accumulation f32.
# ----------------------------------------------------------------------------
def dnn_kernel(x_ref, w_ref, b_ref, o_ref):
    x = x_ref[...].astype(jnp.bfloat16)                      # (TB, D_pad)
    h = jnp.dot(x, w_ref[...],
                preferred_element_type=jnp.float32) + b_ref[...]
    # Exact sigmoid: exp on the EUP, f32 divide; VPU/MXU unaffected.
    o_ref[...] = (1.0 / (1.0 + jnp.exp(-h))).astype(o_ref.dtype)


# ----------------------------------------------------------------------------
# Parameter packing: collapse the activation-free chain into one affine layer
# (computed in f32), zero-pad to lane multiples, cast the weight to bf16 once.
# ----------------------------------------------------------------------------
def pack_params(params):
    (w1, b1), (w2, b2), (w3, b3), (w4, b4) = params
    d_in = w1.shape[0]
    d_out = w4.shape[1]
    d_in_p = _round_up(d_in, LANE)
    d_out_p = _round_up(d_out, LANE)

    # Collapse in f32 (exact: no nonlinearity between the linears).
    w_total = w1 @ w2 @ w3 @ w4                               # (d_in, d_out)
    b_total = ((b1 @ w2 + b2) @ w3 + b3) @ w4 + b4            # (1, d_out)

    w_p = jnp.pad(
        w_total, ((0, d_in_p - d_in), (0, d_out_p - d_out))
    ).astype(jnp.bfloat16)
    b_p = jnp.pad(
        b_total.reshape(1, -1).astype(jnp.float32),
        ((0, 0), (0, d_out_p - d_out)),
    )
    return (w_p, b_p), d_in, d_in_p, d_out, d_out_p


# ----------------------------------------------------------------------------
# Batch-tile selection: largest tile with small pad waste; prefer >= 2 grid
# steps (v7x megacore) when the batch allows it.
# ----------------------------------------------------------------------------
def _choose_tb(B):
    b8 = _round_up(B, SUBLANE)
    tb = SUBLANE
    for cand in (1024, 512, 256, 128, 64, SUBLANE):
        if cand <= b8 and _round_up(b8, cand) - B <= max(B // 8, SUBLANE):
            tb = cand
            break
    # Keep at least 2 grid steps when possible so the "parallel" batch axis
    # can be split across both TensorCores on v7x.
    if tb > SUBLANE and _round_up(b8, tb) // tb < 2:
        half = max(SUBLANE, tb // 2)
        if _round_up(b8, half) // half >= 2:
            tb = half
    b_pad = _round_up(b8, tb)
    return tb, b_pad


# ----------------------------------------------------------------------------
# Wrapper: flatten NCHW, pad batch/features (f32, only if needed), run the
# batch-tiled pallas_call, slice back to (B, out_dim).
# ----------------------------------------------------------------------------
def dnn_forward(x, packed, d_in, d_in_p, d_out, d_out_p):
    w_p, b_p = packed
    B = x.shape[0]
    x2d = x.reshape(B, -1)                 # nn.Flatten(): row-major flatten

    tb, b_pad = _choose_tb(B)
    if b_pad != B or d_in_p != d_in:
        x2d = jnp.pad(x2d, ((0, b_pad - B), (0, d_in_p - d_in)))

    out_p = pl.pallas_call(
        dnn_kernel,
        out_shape=jax.ShapeDtypeStruct((b_pad, d_out_p), jnp.float32),
        grid=(b_pad // tb,),
        in_specs=[
            pl.BlockSpec((tb, d_in_p), lambda i: (i, 0)),
            pl.BlockSpec((d_in_p, d_out_p), lambda i: (0, 0)),   # VMEM-resident
            pl.BlockSpec((1, d_out_p), lambda i: (0, 0)),        # VMEM-resident
        ],
        out_specs=pl.BlockSpec((tb, d_out_p), lambda i: (i, 0)),
        compiler_params=pltpu.CompilerParams(
            dimension_semantics=("parallel",),
        ),
    )(x2d, w_p, b_p)

    return out_p[:B, :d_out]


# ----------------------------------------------------------------------------
# Deterministic parameter init (PyTorch-Linear-style uniform bounds), weights
# stored as (in_features, out_features).
# ----------------------------------------------------------------------------
def init_params(key, input_dim, output_dim):
    dims = [input_dim, 500, 250, 125, output_dim]
    params = []
    for i in range(4):
        fan_in, fan_out = dims[i], dims[i + 1]
        key, kw, kb = jax.random.split(key, 3)
        bound = 1.0 / (fan_in ** 0.5)
        w = jax.random.uniform(kw, (fan_in, fan_out), jnp.float32, -bound, bound)
        b = jax.random.uniform(kb, (1, fan_out), jnp.float32, -bound, bound)
        params.append((w, b))
    return params


def dnn_reference_f32(x, params):
    """Pure-JAX f32 chained reference (PyTorch semantics)."""
    h = x.reshape(x.shape[0], -1)
    for w, b in params:
        h = h @ w + b
    return jax.nn.sigmoid(h)


def dnn_reference_collapsed(x, params):
    """Pure-JAX reference matching the kernel's collapsed bf16-weight math."""
    (w1, b1), (w2, b2), (w3, b3), (w4, b4) = params
    w_total = (w1 @ w2 @ w3 @ w4).astype(jnp.bfloat16)
    b_total = ((b1 @ w2 + b2) @ w3 + b3) @ w4 + b4
    h = x.reshape(x.shape[0], -1).astype(jnp.bfloat16)
    z = jnp.dot(h, w_total, preferred_element_type=jnp.float32) + b_total
    return jax.nn.sigmoid(z)


if __name__ == "__main__":
    key = jax.random.PRNGKey(0)

    # Small NCHW input consistent with flatten -> Linear(input_dim, 500).
    B, C, H, W = 2, 4, 8, 8
    input_dim = C * H * W            # 256
    output_dim = 10

    key, kx = jax.random.split(key)
    x = jax.random.normal(kx, (B, C, H, W), dtype=jnp.float32)
    params = init_params(key, input_dim, output_dim)

    packed, d_in, d_in_p, d_out, d_out_p = pack_params(params)

    out = dnn_forward(x, packed, d_in, d_in_p, d_out, d_out_p)
    out = jax.block_until_ready(out)
    assert out.shape == (B, output_dim)

    ref_match = dnn_reference_collapsed(x, params)
    ref_f32 = dnn_reference_f32(x, params)
    assert jnp.allclose(out, ref_match, atol=1e-4, rtol=1e-4), \
        "mismatch vs collapsed-math reference"
    assert jnp.allclose(out, ref_f32, atol=3e-2), "mismatch vs f32 reference"

    print("KERNEL_OK")
</pallas_src>

<mosaic_0001>
module attributes {stable_mosaic.version = 11 : i64} {
  func.func @dnn_kernel(%arg0: i32, %arg1: memref<8x256xf32, #tpu.memory_space<vmem>>, %arg2: memref<256x128xbf16, #tpu.memory_space<vmem>>, %arg3: memref<1x128xf32, #tpu.memory_space<vmem>>, %arg4: memref<8x128xf32, #tpu.memory_space<vmem>>) attributes {dimension_semantics = [#tpu.dimension_semantics<parallel>], iteration_bounds = array<i64: 1>, scalar_prefetch = 0 : i64, scratch_operands = 0 : i64, tpu.core_type = #tpu.core_type<tc>, window_params = [{transform_indices = @transform_0, window_bounds = array<i64: 8, 256>}, {pipeline_mode = #tpu.pipeline_mode<synchronous>, transform_indices = @transform_1, window_bounds = array<i64: 256, 128>}, {pipeline_mode = #tpu.pipeline_mode<synchronous>, transform_indices = @transform_2, window_bounds = array<i64: 1, 128>}, {transform_indices = @transform_3, window_bounds = array<i64: 8, 128>}]} {
    %c0 = arith.constant 0 : index
    %c0_0 = arith.constant 0 : index
    %0 = vector.load %arg1[%c0, %c0_0] : memref<8x256xf32, #tpu.memory_space<vmem>>, vector<8x256xf32>
    %1 = arith.truncf %0 : vector<8x256xf32> to vector<8x256xbf16>
    %c0_1 = arith.constant 0 : index
    %c0_2 = arith.constant 0 : index
    %2 = vector.load %arg2[%c0_1, %c0_2] : memref<256x128xbf16, #tpu.memory_space<vmem>>, vector<256x128xbf16>
    %cst = arith.constant dense<0.000000e+00> : vector<8x128xf32>
    %3 = tpu.matmul %1, %2, %cst {dimension_numbers = #tpu.dot_dimension_numbers<[1], [0], [0], [1], [0, 0, 1, 1], [], []>} : vector<8x256xbf16>, vector<256x128xbf16>, vector<8x128xf32> -> vector<8x128xf32>
    %c0_3 = arith.constant 0 : index
    %c0_4 = arith.constant 0 : index
    %4 = vector.load %arg3[%c0_3, %c0_4] : memref<1x128xf32, #tpu.memory_space<vmem>>, vector<1x128xf32>
    %5 = vector.broadcast %4 : vector<1x128xf32> to vector<8x128xf32>
    %6 = arith.addf %3, %5 : vector<8x128xf32>
    %cst_5 = arith.constant 0.000000e+00 : f32
    %7 = vector.broadcast %cst_5 : f32 to vector<8x128xf32>
    %8 = arith.subf %7, %6 : vector<8x128xf32>
    %9 = math.exp %8 : vector<8x128xf32>
    %cst_6 = arith.constant 1.000000e+00 : f32
    %10 = vector.broadcast %cst_6 : f32 to vector<8x128xf32>
    %11 = arith.addf %10, %9 : vector<8x128xf32>
    %cst_7 = arith.constant 1.000000e+00 : f32
    %12 = vector.broadcast %cst_7 : f32 to vector<8x128xf32>
    %13 = arith.divf %12, %11 : vector<8x128xf32>
    %c0_8 = arith.constant 0 : index
    %c0_9 = arith.constant 0 : index
    %14 = vector.load %arg4[%c0_8, %c0_9] : memref<8x128xf32, #tpu.memory_space<vmem>>, vector<8x128xf32>
    tpu.vector_store %arg4[%c0_8, %c0_9], %13 {strides = array<i32>} : memref<8x128xf32, #tpu.memory_space<vmem>>, vector<8x128xf32>,
    return
  }
  func.func @transform_0(%arg0: i32) -> (i32, i32) {
    %c0_i32 = arith.constant 0 : i32
    %c0_i32_0 = arith.constant 0 : i32
    return %arg0, %c0_i32 : i32, i32
  }
  func.func @transform_1(%arg0: i32) -> (i32, i32) {
    %c0_i32 = arith.constant 0 : i32
    %c0_i32_0 = arith.constant 0 : i32
    %c0_i32_1 = arith.constant 0 : i32
    return %c0_i32, %c0_i32_0 : i32, i32
  }
  func.func @transform_2(%arg0: i32) -> (i32, i32) {
    %c0_i32 = arith.constant 0 : i32
    %c0_i32_0 = arith.constant 0 : i32
    %c0_i32_1 = arith.constant 0 : i32
    return %c0_i32, %c0_i32_0 : i32, i32
  }
  func.func @transform_3(%arg0: i32) -> (i32, i32) {
    %c0_i32 = arith.constant 0 : i32
    %c0_i32_0 = arith.constant 0 : i32
    return %arg0, %c0_i32 : i32, i32
  }
}

</mosaic_0001>

<bundles_post_ra>
// kernel: tpu_custom_call.1
= control target key start
LH: loop header
LB: loop body
LE: loop exit
PB: predicated region body
PF: predicated region fallthrough
CT: control target
= control target key end

     0   :  { %8 = vsyncpa [#allocation3], 0  ;;  %s451_s0 = inlined_call_operand.hbm [shape: f32[8,256], index: 0, kind: input, shape index: {}]   ;;  %s452_s1 = inlined_call_operand.hbm [shape: bf16[256,128], index: 1, kind: input, shape index: {}]   ;;  %s453_s2 = inlined_call_operand.vmem [shape: f32[1,128], index: 2, kind: input, shape index: {}]   ;;  %s454_s3 = inlined_call_operand.hbm [shape: f32[8,128], index: 3, kind: output, shape index: {}]  }
   0x1   :  { %9 = vsyncpa [#allocation6], 0 }
   0x2   :  { %10 = vsyncpa [#allocation4], 0  ;;  %s380_s12 = smov [#allocation2]   ;;  %s381_s14 = smov [#allocation5]  }
   0x3   :  { %s17_s13 = sshll.u32 %s380_s12, 4  ;;  %s26_s15 = sshll.u32 %s381_s14, 4  ;;  %s18_s13 = int_to_ptr.vmem [resolvable:$true] %s17_s13  ;;  %s405_s15 = int_to_ptr.vmem [resolvable:$true] %s26_s15 }
   0x4   :  { %s308_s18 = scalar_lea.hbm %s451_s0, 256 }
   0x5   :  { %p309_p0 = scmp.ne.s32.totalorder %s451_s0, %s308_s18  ;;  %p312_p1 = scmp.lt.u32.totalorder %s308_s18, %s451_s0 }
   0x7   :  { %p314_p2 = pnand %p312_p1, %p309_p0 }
   0x9   :  { %317 = shalt.err (!%p314_p2)
}
   0xa   :  { %s318_s23 = scalar_lea.vmem %s18_s13, 256  ;;  %p323_p4 = scmp.lt.s32.totalorder %s18_s13, %s18_s13 }
   0xb   :  { %p319_p3 = scmp.ne.s32.totalorder %s18_s13, %s318_s23  ;;  %p324_p5 = scmp.lt.s32.totalorder %s318_s23, %s318_s23 }
   0xd   :  { %p325_p6 = por %p324_p5, %p323_p4 }
   0xf   :  { %p326_p7 = pnand %p325_p6, %p319_p3 }
  0x11   :  { %329 = shalt.err (!%p326_p7)
}
  0x12   :  { %20 = dma.hbm_to_vmem [thread:$0]  %s451_s0, 256, %s18_s13, [#allocation3]  }
  0x13   :  { %s330_s28 = scalar_lea.hbm %s452_s1, 2048 }
  0x14   :  { %p331_p8 = scmp.ne.s32.totalorder %s452_s1, %s330_s28  ;;  %p334_p9 = scmp.lt.u32.totalorder %s330_s28, %s452_s1 }
  0x16   :  { %p336_p10 = pnand %p334_p9, %p331_p8 }
  0x18   :  { %339 = shalt.err (!%p336_p10)
}
  0x19   :  { %s340_s6 = scalar_lea.vmem %s405_s15, 2048  ;;  %p345_p12 = scmp.lt.s32.totalorder %s405_s15, %s405_s15 }
  0x1a   :  { %p341_p11 = scmp.ne.s32.totalorder %s405_s15, %s340_s6  ;;  %p346_p13 = scmp.lt.s32.totalorder %s340_s6, %s340_s6 }
  0x1c   :  { %p347_p0 = por %p346_p13, %p345_p12 }
  0x1e   :  { %p348_p1 = pnand %p347_p0, %p341_p11 }
  0x20   :  { %351 = shalt.err (!%p348_p1)
}
  0x21   :  { %s382_s0 = smov 64   ;;  %s383_s7 = smov 4  }
  0x22   :  { %32 = dma.hbm_to_vmem [thread:$0]  %s452_s1, 2048, %s405_s15, [#allocation6], %s382_s0, %s382_s0, %s383_s7  }
  0x23   :  { %374 = dma.done.wait [#allocation3], 256  }
  0x24   :  { %375 = vsyncadd [#allocation3], 4294967040 }
  0x25   :  { %376 = dma.done.wait [#allocation6], 2048  }
  0x26   :  { %377 = vsyncadd [#allocation6], 4294965248  ;;  %v288_v0 = vld [vmem:[#allocation5 + $0x40] sm:$0xff]   ;;  %v290_v2 = vld [vmem:[#allocation5 + $0x48] sm:$0xff]   ;;  %s384_s11 = smov [#allocation7]  }
  0x27   :  { %v289_v1 = vld [vmem:[#allocation5] sm:$0xff]   ;;  %261 = vmatprep.subr.bf16.mxu0 %v288_v0  ;;  %v291_v3 = vld [vmem:[#allocation5 + $0x8] sm:$0xff]   ;;  %v292_v4 = vld [vmem:[#allocation5 + $0x50] sm:$0xff]   ;;  %s234_s12 = sshll.u32 %s384_s11, 4  ;;  %s235_s12 = int_to_ptr.vmem [resolvable:$true] %s234_s12 }
  0x28   :  { %262 = vmatpush3.bf16.msra.mxu0 %v289_v1  ;;  %v293_v5 = vld [vmem:[#allocation5 + $0x10] sm:$0xff]   ;;  %v294_v6 = vld [vmem:[#allocation5 + $0x58] sm:$0xff]   ;;  %v296_v8 = vld [vmem:[#allocation5 + $0x60] sm:$0xff]   ;;  %s352_s13 = scalar_lea.vmem %s235_s12, 128  ;;  %p357_p3 = scmp.lt.s32.totalorder %s235_s12, %s235_s12 }
  0x29   :  { %263 = vmatprep.subr.bf16.mxu0 %v290_v2  ;;  %v295_v7 = vld [vmem:[#allocation5 + $0x18] sm:$0xff]   ;;  %v297_v9 = vld [vmem:[#allocation5 + $0x20] sm:$0xff]   ;;  %v298_v10 = vld [vmem:[#allocation5 + $0x68] sm:$0xff]   ;;  %p353_p2 = scmp.ne.s32.totalorder %s235_s12, %s352_s13  ;;  %p358_p4 = scmp.lt.s32.totalorder %s352_s13, %s352_s13 }
  0x2a   :  { %v43_v11 = vld [vmem:[#allocation2 + $0x8] sm:$0xff]  ;;  %v299_v13 = vld [vmem:[#allocation5 + $0x28] sm:$0xff]   ;;  %v300_v14 = vld [vmem:[#allocation5 + $0x70] sm:$0xff]  }
  0x2b   :  { %v45_v12 = vpack.c.bf16 %v43_v11, %v43_v11  ;;  %v301_v15 = vld [vmem:[#allocation5 + $0x30] sm:$0xff]   ;;  %v302_v16 = vld [vmem:[#allocation5 + $0x78] sm:$0xff]   ;;  %p359_p5 = por %p358_p4, %p357_p3 }
  0x2c   :  { %264 = vmatpush3.bf16.msra.mxu0 %v291_v3  ;;  %v303_v17 = vld [vmem:[#allocation5 + $0x38] sm:$0xff]   ;;  %v42_v18 = vld [vmem:[#allocation2] sm:$0xff] }
  0x2d   :  { %265 = vmatprep.subr.bf16.mxu0 %v292_v4  ;;  %213 = vmatprep.mubr.bf16.mxu0 %v45_v12  ;;  %v44_v19 = vpack.c.bf16 %v42_v18, %v42_v18  ;;  %v244_v21 = vld [vmem:[%s453_s2] ss:$0 sm:$0xff]  ;;  %p360_p6 = pnand %p359_p5, %p353_p2 }
  0x30   :  { %266 = vmatpush3.bf16.msra.mxu0 %v293_v5 }
  0x31   :  { %267 = vmatprep.subr.bf16.mxu0 %v294_v6 }
  0x34   :  { %268 = vmatpush3.bf16.msra.mxu0 %v295_v7 }
  0x35   :  { %269 = vmatprep.subr.bf16.mxu0 %v296_v8 }
  0x38   :  { %270 = vmatpush3.bf16.msra.mxu0 %v297_v9 }
  0x39   :  { %271 = vmatprep.subr.bf16.mxu0 %v298_v10 }
  0x3c   :  { %272 = vmatpush3.bf16.msra.mxu0 %v299_v13 }
  0x3d   :  { %273 = vmatprep.subr.bf16.mxu0 %v300_v14 }
  0x40   :  { %274 = vmatpush3.bf16.msra.mxu0 %v301_v15 }
  0x41   :  { %275 = vmatprep.subr.bf16.mxu0 %v302_v16 }
  0x44   :  { %276 = vmatpush3.bf16.msra.mxu0 %v303_v17 }
  0x47   :  { %214 = vmatmul.mubr.bf16.vlgmr.msra.gmra.mrb[0].mxu0 %v44_v19 }
 0x11a   :  { %v277_v20 = vpop.f32.mrb[0].mxu0 }
 0x11b   :  { %v278_v22 = vpop.f32.mrb[1].mxu0 }
 0x11c   :  { %v279_v23 = vadd.f32 %v278_v22, %v277_v20  ;;  %v280_v24 = vpop.f32.mrb[2].mxu0 }
 0x11d   :  { %v281_v25 = vpop.f32.mrb[3].mxu0 }
 0x11e   :  { %v216_v26 = vadd.f32 %v279_v23, %v244_v21 }
 0x120   :  { %v221_v27 = vsub.f32 0.0, %v216_v26 }
 0x122   :  { %v222_v28 = vmul.f32 1.442695, %v221_v27 }
 0x124   :  { %304 = vpow2.f32 %v222_v28 }
 0x12e   :  { %v305_v29 = vpop.eup %304 }
 0x12f   :  { %v224_v30 = vadd.f32 1.0, %v305_v29 }
 0x131   :  { %306 = vrcp.f32 %v224_v30 }
 0x13b   :  { %v307_v31 = vpop.eup %306 }
 0x13c   :  { %227 = vst [vmem:[#allocation7] sm:$0xff] %v307_v31 }
 0x13d   :  { %363 = shalt.err (!%p360_p6)
}
 0x13e   :  { %s364_s15 = scalar_lea.hbm %s454_s3, 128 }
 0x13f   :  { %p365_p7 = scmp.ne.s32.totalorder %s454_s3, %s364_s15  ;;  %p368_p8 = scmp.lt.u32.totalorder %s364_s15, %s454_s3 }
 0x141   :  { %p370_p9 = pnand %p368_p8, %p365_p7 }
 0x143   :  { %373 = shalt.err (!%p370_p9)
}
 0x144   :  { %237 = dma.vmem_to_hbm [thread:$0]  %s235_s12, 128, %s454_s3, [#allocation4]  }
 0x145   :  { %378 = dma.done.wait [#allocation4], 128  }
 0x146   :  { %379 = vsyncadd [#allocation4], 4294967168 }
 0x147   :  { %241 = vsyncpa [#allocation3], 1 }
 0x148   :  { %242 = vsyncpa [#allocation6], 1 }
 0x149   :  { %243 = vsyncpa [#allocation4], 1 }

</bundles_post_ra>
